<compile_context>
chip_gen: v7x
topology: tpu7x:2x2x1
jax: 0.10.0
libtpu: 0.0.40
codegen_flags: <defaults>
</compile_context>

<pallas_src>
import functools

import jax
import jax.numpy as jnp
from jax import lax
from jax.experimental import pallas as pl
from jax.experimental.pallas import tpu as pltpu

LANES = 128  # TPU vreg lane width.


def _round_up(v, m):
    return ((v + m - 1) // m) * m


def _pick_tile(dim, candidates):
    for c in candidates:
        if dim % c == 0:
            return c
    return dim


# -----------------------------------------------------------------------------------------
# Kernel A: pred = x @ W, gridded (sample_block "parallel", gene_block "arbitrary").
# VPU multiply + lane reduction (no 1-column MXU matvec); accumulates in the f32 output.
# -----------------------------------------------------------------------------------------
def _matvec_kernel(x_ref, w_ref, pred_ref):
    g = pl.program_id(1)

    @pl.when(g == 0)
    def _init():
        pred_ref[...] = jnp.zeros_like(pred_ref)

    pred_ref[...] += jnp.sum(x_ref[...] * w_ref[...], axis=1, keepdims=True)


# -----------------------------------------------------------------------------------------
# Kernel B: risk-set prefix sums, diff and the negative partial log-likelihood on the
# time-sorted, lane-dense pred.  O(N*128) work via block-triangular matmuls.
# -----------------------------------------------------------------------------------------
def _cox_loss_kernel(pred_ref, ev_ref, rss_ref, diff_ref, loss_ref, *, n_valid):
    pred = pred_ref[...]                                  # (nb, 128) sorted, lane-dense
    ev = ev_ref[...]
    nb = pred.shape[0]

    blk = lax.broadcasted_iota(jnp.int32, (nb, LANES), 0)
    lane = lax.broadcasted_iota(jnp.int32, (nb, LANES), 1)
    valid = (blk * LANES + lane) < n_valid

    # Max-subtraction stabilization (exact: the constant shift cancels inside the log).
    m = jnp.max(jnp.where(valid, pred, -jnp.inf))
    e = jnp.where(valid, jnp.exp(pred - m), 0.0)

    # Inclusive prefix sum over the sorted sample axis (== tril(ones) @ exp(pred)):
    #   within each 128-sample block: (nb,128)@(128,128) triangular matmul
    #   across blocks: (nb,nb)@(nb,128) with per-block totals lane-replicated
    jj = lax.broadcasted_iota(jnp.int32, (LANES, LANES), 0)
    ii = lax.broadcasted_iota(jnp.int32, (LANES, LANES), 1)
    upper_inc = (jj <= ii).astype(jnp.float32)            # U[j, i] = 1 iff j <= i
    scan_in_block = jnp.dot(e, upper_inc, preferred_element_type=jnp.float32)
    if nb > 1:
        block_tot = jnp.broadcast_to(scan_in_block[:, LANES - 1:], (nb, LANES))
        rb = lax.broadcasted_iota(jnp.int32, (nb, nb), 0)
        cb = lax.broadcasted_iota(jnp.int32, (nb, nb), 1)
        strict_lower = (cb < rb).astype(jnp.float32)
        block_off = jnp.dot(strict_lower, block_tot, preferred_element_type=jnp.float32)
        risk_stab = scan_in_block + block_off
    else:
        risk_stab = scan_in_block

    log_risk = m + jnp.log(risk_stab)                     # = log(risk_set_sum)
    diff = pred - log_risk

    n_observed = jnp.sum(ev) + 1e-06
    cost = -(jnp.sum(diff * ev) / n_observed)

    rss_ref[...] = risk_stab * jnp.exp(m)                 # un-stabilized risk_set_sum
    diff_ref[...] = diff
    loss_ref[0] = cost                                    # scalar -> SMEM


# -----------------------------------------------------------------------------------------
# Kernel C: concordance index over only the lower-triangular (ts x ts) tile pairs.
# (r, c) tile indices are scalar-prefetched; results accumulate into SMEM scalars.
# -----------------------------------------------------------------------------------------
def _cindex_kernel(r_tbl_ref, c_tbl_ref, pred_col_ref, ev_col_ref, pred_row_ref,
                   conc_ref, eps_ref, *, ts):
    s = pl.program_id(0)
    r = r_tbl_ref[s]
    c = c_tbl_ref[s]

    @pl.when(s == 0)
    def _init():
        conc_ref[0] = jnp.float32(0.0)
        eps_ref[0] = jnp.float32(0.0)

    p_i = pred_col_ref[...]                               # (ts, 1)  rows i of this tile
    e_i = ev_col_ref[...]                                 # (ts, 1)
    p_j = pred_row_ref[...]                               # (1, ts)  cols j of this tile

    d = p_i - p_j                                         # (ts, ts)  pred_i - pred_j
    score = jnp.where(d > 0, 1.0, jnp.where(d == 0, 0.5, 0.0))
    ev_ok = e_i != 0.0                                    # (ts, 1)  uncensored rows

    @pl.when(c < r)   # interior lower-triangular tile: every (row, col) pair has col < row
    def _interior():
        conc_ref[0] += jnp.sum(jnp.where(ev_ok, score, 0.0))
        eps_ref[0] += float(ts) * jnp.sum(jnp.where(ev_ok, 1.0, 0.0))

    @pl.when(c == r)  # diagonal-straddling tile: needs the strict-lower mask
    def _diag():
        ii = lax.broadcasted_iota(jnp.int32, (ts, ts), 0)
        jj = lax.broadcasted_iota(jnp.int32, (ts, ts), 1)
        ok = jnp.logical_and(jj < ii, ev_ok)
        conc_ref[0] += jnp.sum(jnp.where(ok, score, 0.0))
        eps_ref[0] += jnp.sum(jnp.where(ok, 1.0, 0.0))


# -----------------------------------------------------------------------------------------
# Wrapper mirroring cox_module.forward.
# -----------------------------------------------------------------------------------------
def cox_forward(x, event, time, W):
    """Returns ((loss[(1,)], (risksets, diff, pred, my_time, my_event)), concordance)."""
    x = jnp.asarray(x, jnp.float32)
    event = jnp.asarray(event, jnp.float32).reshape(-1)
    time = jnp.asarray(time, jnp.float32).reshape(-1)
    W = jnp.asarray(W, jnp.float32).reshape(-1)

    N, G = x.shape
    n_pad = _round_up(N, LANES)
    g_pad = _round_up(G, LANES)
    nb = n_pad // LANES

    # ---- Kernel A: pred = x @ W in x's original order/layout (no gather / transpose) -----
    x_p = x if (n_pad == N and g_pad == G) else jnp.pad(x, ((0, n_pad - N), (0, g_pad - G)))
    w_row = (W if g_pad == G else jnp.pad(W, (0, g_pad - G))).reshape(1, g_pad)

    tn = _pick_tile(n_pad, (512, 256, 128))
    tg = _pick_tile(g_pad, (1024, 512, 256, 128))

    pred_col = pl.pallas_call(
        _matvec_kernel,
        out_shape=jax.ShapeDtypeStruct((n_pad, 1), jnp.float32),
        grid=(n_pad // tn, g_pad // tg),
        in_specs=[pl.BlockSpec((tn, tg), lambda i, g: (i, g)),
                  pl.BlockSpec((1, tg), lambda i, g: (0, g))],
        out_specs=pl.BlockSpec((tn, 1), lambda i, g: (i, 0)),
        compiler_params=pltpu.CompilerParams(
            dimension_semantics=("parallel", "arbitrary"),
            vmem_limit_bytes=32 * 1024 * 1024),
    )(x_p, w_row)
    pred_unsorted = pred_col.reshape(-1)[:N]

    # ---- Stable descending sort by time; permute only length-N vectors (plain JAX) -------
    order = jnp.argsort(-time, stable=True)
    ev_s = event[order]
    t_s = time[order]
    pred_s = pred_unsorted[order]

    pad_n = n_pad - N
    pred_pad = jnp.pad(pred_s, (0, pad_n)) if pad_n else pred_s
    ev_pad = jnp.pad(ev_s, (0, pad_n)) if pad_n else ev_s

    # ---- Kernel B: risk-set prefix sums, diff, loss ---------------------------------------
    loss_kernel = functools.partial(_cox_loss_kernel, n_valid=N)
    rss_blk, diff_blk, loss = pl.pallas_call(
        loss_kernel,
        out_shape=(jax.ShapeDtypeStruct((nb, LANES), jnp.float32),   # risk_set_sum
                   jax.ShapeDtypeStruct((nb, LANES), jnp.float32),   # diff
                   jax.ShapeDtypeStruct((1,), jnp.float32)),         # loss (SMEM scalar)
        in_specs=[pl.BlockSpec(memory_space=pltpu.MemorySpace.VMEM),
                  pl.BlockSpec(memory_space=pltpu.MemorySpace.VMEM)],
        out_specs=(pl.BlockSpec(memory_space=pltpu.MemorySpace.VMEM),
                   pl.BlockSpec(memory_space=pltpu.MemorySpace.VMEM),
                   pl.BlockSpec(memory_space=pltpu.MemorySpace.SMEM)),
    )(pred_pad.reshape(nb, LANES), ev_pad.reshape(nb, LANES))

    # ---- Kernel C: concordance index over lower-triangular tiles only ---------------------
    ts = _pick_tile(n_pad, (512, 256, 128))
    nt = n_pad // ts
    rc = [(r, c) for r in range(nt) for c in range(r + 1)]
    r_tbl = jnp.asarray([p[0] for p in rc], jnp.int32)
    c_tbl = jnp.asarray([p[1] for p in rc], jnp.int32)

    cindex_kernel = functools.partial(_cindex_kernel, ts=ts)
    conc, eps = pl.pallas_call(
        cindex_kernel,
        out_shape=(jax.ShapeDtypeStruct((1,), jnp.float32),
                   jax.ShapeDtypeStruct((1,), jnp.float32)),
        grid_spec=pltpu.PrefetchScalarGridSpec(
            num_scalar_prefetch=2,
            grid=(len(rc),),
            in_specs=[pl.BlockSpec((ts, 1), lambda s, rt, ct: (rt[s], 0)),
                      pl.BlockSpec((ts, 1), lambda s, rt, ct: (rt[s], 0)),
                      pl.BlockSpec((1, ts), lambda s, rt, ct: (0, ct[s]))],
            out_specs=(pl.BlockSpec(memory_space=pltpu.MemorySpace.SMEM),
                       pl.BlockSpec(memory_space=pltpu.MemorySpace.SMEM))),
        compiler_params=pltpu.CompilerParams(
            dimension_semantics=("arbitrary",),
            vmem_limit_bytes=32 * 1024 * 1024),
    )(r_tbl, c_tbl,
      pred_pad.reshape(n_pad, 1), ev_pad.reshape(n_pad, 1), pred_pad.reshape(1, n_pad))

    concordance = conc[0] / (eps[0] + 1e-06)

    # Back to the (N, 1) shapes the torch module returns.
    pred = pred_s.reshape(N, 1)
    risksets = rss_blk.reshape(-1)[:N].reshape(N, 1)
    diff = diff_blk.reshape(-1)[:N].reshape(N, 1)
    loss = loss.reshape(-1)                # (1,), matches loss.mean().unsqueeze(-1)

    return (loss, (risksets, diff, pred, t_s, ev_s)), concordance


if __name__ == "__main__":
    key = jax.random.PRNGKey(0)
    k_x, k_w, k_e, k_t = jax.random.split(key, 4)

    N, G = 8, 32                                  # N samples, G genes (in_dim2)
    x = jax.random.normal(k_x, (N, G), dtype=jnp.float32)
    W = jax.random.normal(k_w, (G, 1), dtype=jnp.float32) * 0.1   # cox_weights_list (G, 1)
    event = (jax.random.uniform(k_e, (N,)) < 0.7).astype(jnp.float32)
    time = jax.random.uniform(k_t, (N,), dtype=jnp.float32) * 10.0

    (loss, (risksets, diff, pred, my_time, my_event)), concordance = cox_forward(
        x, event, time, W)
    jax.block_until_ready((loss, risksets, diff, pred, my_time, my_event, concordance))

    # Shape contract of the torch module.
    assert loss.shape == (1,)
    assert risksets.shape == (N, 1) and diff.shape == (N, 1) and pred.shape == (N, 1)

    # Pure-JAX reference (same math as the torch module).
    o = jnp.argsort(-time, stable=True)
    xw = (x[o, :] @ W.reshape(G, 1)).reshape(-1)
    ev_r = event[o]
    tril = jnp.tril(jnp.ones((N, N), jnp.float32))
    rss_r = tril @ jnp.exp(xw)
    diff_r = xw - jnp.log(rss_r)
    loss_r = -(jnp.sum(diff_r * ev_r) / (jnp.sum(ev_r) + 1e-06))
    ytm = jnp.where(ev_r[:, None] != 0, tril - jnp.eye(N), 0.0)
    pd = xw[:, None] - xw[None, :]
    pm = jnp.where(pd > 0, 1.0, jnp.where(pd == 0, 0.5, 0.0))
    ci_r = jnp.sum(pm * ytm) / (jnp.sum(ytm) + 1e-06)

    assert jnp.allclose(pred.reshape(-1), xw, rtol=2e-3, atol=2e-3)
    assert jnp.allclose(risksets.reshape(-1), rss_r, rtol=2e-3, atol=2e-3)
    assert jnp.allclose(diff.reshape(-1), diff_r, rtol=2e-3, atol=2e-3)
    assert jnp.allclose(loss[0], loss_r, rtol=2e-3, atol=2e-3)
    assert jnp.allclose(concordance, ci_r, rtol=1e-3, atol=1e-3)

    print("KERNEL_OK")
</pallas_src>

<mosaic_0001>
module attributes {stable_mosaic.version = 11 : i64} {
  func.func @_matvec_kernel(%arg0: i32, %arg1: i32, %arg2: memref<128x128xf32, #tpu.memory_space<vmem>>, %arg3: memref<1x128xf32, #tpu.memory_space<vmem>>, %arg4: memref<128x1xf32, #tpu.memory_space<vmem>>) attributes {dimension_semantics = [#tpu.dimension_semantics<parallel>, #tpu.dimension_semantics<arbitrary>], iteration_bounds = array<i64: 1, 1>, scalar_prefetch = 0 : i64, scratch_operands = 0 : i64, tpu.core_type = #tpu.core_type<tc>, window_params = [{transform_indices = @transform_0, window_bounds = array<i64: 128, 128>}, {transform_indices = @transform_1, window_bounds = array<i64: 1, 128>}, {transform_indices = @transform_2, window_bounds = array<i64: 128, 1>}]} {
    %c0_i32 = arith.constant 0 : i32
    %0 = arith.cmpi eq, %arg1, %c0_i32 : i32
    %1 = arith.extui %0 : i1 to i32
    %c0_i32_0 = arith.constant 0 : i32
    %2 = arith.cmpi ne, %1, %c0_i32_0 : i32
    scf.if %2 {
      %cst_8 = arith.constant 0.000000e+00 : f32
      %12 = vector.broadcast %cst_8 : f32 to vector<128x1xf32>
      %c0_9 = arith.constant 0 : index
      %c0_10 = arith.constant 0 : index
      %13 = vector.load %arg4[%c0_9, %c0_10] : memref<128x1xf32, #tpu.memory_space<vmem>>, vector<128x1xf32>
      tpu.vector_store %arg4[%c0_9, %c0_10], %12 {strides = array<i32>} : memref<128x1xf32, #tpu.memory_space<vmem>>, vector<128x1xf32>,
    } else {
    }
    %c0 = arith.constant 0 : index
    %c0_1 = arith.constant 0 : index
    %3 = vector.load %arg4[%c0, %c0_1] : memref<128x1xf32, #tpu.memory_space<vmem>>, vector<128x1xf32>
    %c0_2 = arith.constant 0 : index
    %c0_3 = arith.constant 0 : index
    %4 = vector.load %arg2[%c0_2, %c0_3] : memref<128x128xf32, #tpu.memory_space<vmem>>, vector<128x128xf32>
    %c0_4 = arith.constant 0 : index
    %c0_5 = arith.constant 0 : index
    %5 = vector.load %arg3[%c0_4, %c0_5] : memref<1x128xf32, #tpu.memory_space<vmem>>, vector<1x128xf32>
    %6 = vector.broadcast %5 : vector<1x128xf32> to vector<128x128xf32>
    %7 = arith.mulf %4, %6 : vector<128x128xf32>
    %cst = arith.constant dense<0.000000e+00> : vector<128xf32>
    %8 = vector.multi_reduction <add>, %7, %cst [1] : vector<128x128xf32> to vector<128xf32>
    %9 = vector.shape_cast %8 : vector<128xf32> to vector<128x1xf32>
    %10 = arith.addf %3, %9 : vector<128x1xf32>
    %c0_6 = arith.constant 0 : index
    %c0_7 = arith.constant 0 : index
    %11 = vector.load %arg4[%c0_6, %c0_7] : memref<128x1xf32, #tpu.memory_space<vmem>>, vector<128x1xf32>
    tpu.vector_store %arg4[%c0_6, %c0_7], %10 {strides = array<i32>} : memref<128x1xf32, #tpu.memory_space<vmem>>, vector<128x1xf32>,
    return
  }
  func.func @transform_0(%arg0: i32, %arg1: i32) -> (i32, i32) {
    %c0_i32 = arith.constant 0 : i32
    return %arg0, %arg1 : i32, i32
  }
  func.func @transform_1(%arg0: i32, %arg1: i32) -> (i32, i32) {
    %c0_i32 = arith.constant 0 : i32
    %c0_i32_0 = arith.constant 0 : i32
    return %c0_i32, %arg1 : i32, i32
  }
  func.func @transform_2(%arg0: i32, %arg1: i32) -> (i32, i32) {
    %c0_i32 = arith.constant 0 : i32
    %c0_i32_0 = arith.constant 0 : i32
    return %arg0, %c0_i32 : i32, i32
  }
}

</mosaic_0001>

<bundles_post_ra>
// kernel: tpu_custom_call.1
= control target key start
LH: loop header
LB: loop body
LE: loop exit
PB: predicated region body
PF: predicated region fallthrough
CT: control target
= control target key end

     0   :  { %7 = vsyncpa [#allocation3], 0  ;;  %s200_s9 = smov [#allocation2]   ;;  %s410_s0 = inlined_call_operand.hbm [shape: f32[128,128], index: 0, kind: input, shape index: {}]   ;;  %s411_s1 = inlined_call_operand.vmem [shape: f32[1,128], index: 1, kind: input, shape index: {}]   ;;  %s412_s2 = inlined_call_operand.vmem [shape: f32[128,1], index: 2, kind: output, shape index: {}]  }
   0x1   :  { %s13_s10 = sshll.u32 %s200_s9, 4  ;;  %s176_s13 = scalar_lea.hbm %s410_s0, 2048  ;;  %s14_s10 = int_to_ptr.vmem [resolvable:$true] %s13_s10 }
   0x2   :  { %p177_p0 = scmp.ne.s32.totalorder %s410_s0, %s176_s13  ;;  %p180_p1 = scmp.lt.u32.totalorder %s176_s13, %s410_s0 }
   0x4   :  { %p182_p2 = pnand %p180_p1, %p177_p0 }
   0x6   :  { %185 = shalt.err (!%p182_p2)
}
   0x7   :  { %s186_s18 = scalar_lea.vmem %s14_s10, 2048  ;;  %p191_p4 = scmp.lt.s32.totalorder %s14_s10, %s14_s10 }
   0x8   :  { %p187_p3 = scmp.ne.s32.totalorder %s14_s10, %s186_s18  ;;  %p192_p5 = scmp.lt.s32.totalorder %s186_s18, %s186_s18 }
   0xa   :  { %p193_p6 = por %p192_p5, %p191_p4 }
   0xc   :  { %p194_p7 = pnand %p193_p6, %p187_p3 }
   0xe   :  { %197 = shalt.err (!%p194_p7)
}
   0xf   :  { %s201_s19 = smov 128   ;;  %s202_s20 = smov 8  }
  0x10   :  { %19 = dma.hbm_to_vmem [thread:$0]  %s410_s0, 2048, %s14_s10, [#allocation3], %s201_s19, %s201_s19, %s202_s20  }
  0x11   :  { %198 = dma.done.wait [#allocation3], 2048  }
  0x12   :  { %199 = vsyncadd [#allocation3], 4294965248  ;;  %vm29_vm0 = vcmask 7168   ;;  %v203_v0 = vmov 0.0   ;;  %v64_v1 = vld [vmem:[#allocation2 + $0x10] sm:$0xff]  ;;  %v62_v3 = vld [vmem:[#allocation2] sm:$0xff] }
  0x13   :  { %32 = vst.msk [vmem:[%s412_s2 + $0x10] sm:$0xff] %vm29_vm0, %v203_v0  ;;  %30 = vst.msk [vmem:[%s412_s2] sm:$0xff] %vm29_vm0, %v203_v0  ;;  %v171_v2 = vld [vmem:[%s411_s1] ss:$0 sm:$0xff]  ;;  %v65_v6 = vld [vmem:[#allocation2 + $0x18] sm:$0xff] }
  0x14   :  { %31 = vst.msk [vmem:[%s412_s2 + $0x8] sm:$0xff] %vm29_vm0, %v203_v0  ;;  %33 = vst.msk [vmem:[%s412_s2 + $0x18] sm:$0xff] %vm29_vm0, %v203_v0  ;;  %v87_v4 = vmul.f32 %v171_v2, %v64_v1  ;;  %v85_v5 = vmul.f32 %v171_v2, %v62_v3  ;;  %v63_v7 = vld [vmem:[#allocation2 + $0x8] sm:$0xff]  ;;  %v88_v8 = vmul.f32 %v171_v2, %v65_v6  ;;  %v66_v11 = vld [vmem:[#allocation2 + $0x20] sm:$0xff] }
  0x15   :  { %34 = vst.msk [vmem:[%s412_s2 + $0x20] sm:$0xff] %vm29_vm0, %v203_v0  ;;  %35 = vst.msk [vmem:[%s412_s2 + $0x28] sm:$0xff] %vm29_vm0, %v203_v0  ;;  %v86_v9 = vmul.f32 %v171_v2, %v63_v7  ;;  %v67_v10 = vld [vmem:[#allocation2 + $0x28] sm:$0xff]  ;;  %v89_v13 = vmul.f32 %v171_v2, %v66_v11  ;;  %v69_v14 = vld [vmem:[#allocation2 + $0x38] sm:$0xff] }
  0x16   :  { %36 = vst.msk [vmem:[%s412_s2 + $0x30] sm:$0xff] %vm29_vm0, %v203_v0  ;;  %37 = vst.msk [vmem:[%s412_s2 + $0x38] sm:$0xff] %vm29_vm0, %v203_v0  ;;  %105 = vadd.xlane.f32.xlu1 %v87_v4  ;;  %101 = vadd.xlane.f32.xlu0 %v85_v5  ;;  %v90_v12 = vmul.f32 %v171_v2, %v67_v10  ;;  %v68_v15 = vld [vmem:[#allocation2 + $0x30] sm:$0xff]  ;;  %v92_v16 = vmul.f32 %v171_v2, %v69_v14  ;;  %v71_v18 = vld [vmem:[#allocation2 + $0x48] sm:$0xff] }
  0x17   :  { %38 = vst.msk [vmem:[%s412_s2 + $0x40] sm:$0xff] %vm29_vm0, %v203_v0  ;;  %39 = vst.msk [vmem:[%s412_s2 + $0x48] sm:$0xff] %vm29_vm0, %v203_v0  ;;  %v91_v17 = vmul.f32 %v171_v2, %v68_v15  ;;  %v70_v19 = vld [vmem:[#allocation2 + $0x40] sm:$0xff]  ;;  %v94_v20 = vmul.f32 %v171_v2, %v71_v18  ;;  %v73_v22 = vld [vmem:[#allocation2 + $0x58] sm:$0xff] }
  0x18   :  { %40 = vst.msk [vmem:[%s412_s2 + $0x50] sm:$0xff] %vm29_vm0, %v203_v0  ;;  %41 = vst.msk [vmem:[%s412_s2 + $0x58] sm:$0xff] %vm29_vm0, %v203_v0  ;;  %v93_v21 = vmul.f32 %v171_v2, %v70_v19  ;;  %v72_v23 = vld [vmem:[#allocation2 + $0x50] sm:$0xff]  ;;  %v96_v24 = vmul.f32 %v171_v2, %v73_v22  ;;  %v75_v26 = vld [vmem:[#allocation2 + $0x68] sm:$0xff] }
  0x19   :  { %42 = vst.msk [vmem:[%s412_s2 + $0x60] sm:$0xff] %vm29_vm0, %v203_v0  ;;  %43 = vst.msk [vmem:[%s412_s2 + $0x68] sm:$0xff] %vm29_vm0, %v203_v0  ;;  %v95_v25 = vmul.f32 %v171_v2, %v72_v23  ;;  %v74_v27 = vld [vmem:[#allocation2 + $0x60] sm:$0xff]  ;;  %v98_v28 = vmul.f32 %v171_v2, %v75_v26  ;;  %v77_v30 = vld [vmem:[#allocation2 + $0x78] sm:$0xff] }
  0x1a   :  { %44 = vst.msk [vmem:[%s412_s2 + $0x70] sm:$0xff] %vm29_vm0, %v203_v0  ;;  %45 = vst.msk [vmem:[%s412_s2 + $0x78] sm:$0xff] %vm29_vm0, %v203_v0  ;;  %107 = vadd.xlane.f32.xlu1 %v88_v8  ;;  %103 = vadd.xlane.f32.xlu0 %v86_v9  ;;  %v97_v29 = vmul.f32 %v171_v2, %v74_v27  ;;  %v76_v31 = vld [vmem:[#allocation2 + $0x70] sm:$0xff]  ;;  %v100_v32 = vmul.f32 %v171_v2, %v77_v30  ;;  %v46_v35 = vld [vmem:[%s412_s2] sm:$0xff] }
  0x1b   :  { %v99_v33 = vmul.f32 %v171_v2, %v76_v31  ;;  %v48_v34 = vld [vmem:[%s412_s2 + $0x10] sm:$0xff]  ;;  %v49_v40 = vld [vmem:[%s412_s2 + $0x18] sm:$0xff]  ;;  %v47_v41 = vld [vmem:[%s412_s2 + $0x8] sm:$0xff] }
  0x1c   :  { %v51_v46 = vld [vmem:[%s412_s2 + $0x28] sm:$0xff]  ;;  %v50_v47 = vld [vmem:[%s412_s2 + $0x20] sm:$0xff] }
  0x1d   :  { %v53_v52 = vld [vmem:[%s412_s2 + $0x38] sm:$0xff]  ;;  %v52_v53 = vld [vmem:[%s412_s2 + $0x30] sm:$0xff] }
  0x1e   :  { %111 = vadd.xlane.f32.xlu1 %v90_v12  ;;  %109 = vadd.xlane.f32.xlu0 %v89_v13  ;;  %v55_v58 = vld [vmem:[%s412_s2 + $0x48] sm:$0xff]  ;;  %v54_v59 = vld [vmem:[%s412_s2 + $0x40] sm:$0xff] }
  0x1f   :  { %v57_v0 = vld [vmem:[%s412_s2 + $0x58] sm:$0xff]  ;;  %v56_v1 = vld [vmem:[%s412_s2 + $0x50] sm:$0xff] }
  0x20   :  { %v59_v6 = vld [vmem:[%s412_s2 + $0x68] sm:$0xff]  ;;  %v58_v7 = vld [vmem:[%s412_s2 + $0x60] sm:$0xff] }
  0x21   :  { %v61_v12 = vld [vmem:[%s412_s2 + $0x78] sm:$0xff]  ;;  %v60_v13 = vld [vmem:[%s412_s2 + $0x70] sm:$0xff] }
  0x22   :  { %115 = vadd.xlane.f32.xlu1 %v92_v16  ;;  %113 = vadd.xlane.f32.xlu0 %v91_v17 }
  0x26   :  { %119 = vadd.xlane.f32.xlu1 %v94_v20  ;;  %117 = vadd.xlane.f32.xlu0 %v93_v21 }
  0x2a   :  { %123 = vadd.xlane.f32.xlu1 %v96_v24  ;;  %121 = vadd.xlane.f32.xlu0 %v95_v25 }
  0x2e   :  { %127 = vadd.xlane.f32.xlu1 %v98_v28  ;;  %125 = vadd.xlane.f32.xlu0 %v97_v29 }
  0x32   :  { %131 = vadd.xlane.f32.xlu1 %v100_v32  ;;  %129 = vadd.xlane.f32.xlu0 %v99_v33 }
  0xa3   :  { %v106_v36 = vpop.xlane.xlu1 %105  ;;  %v102_v37 = vpop.xlane.xlu0 %101 }
  0xa4   :  { %v135_v38 = vadd.f32 %v106_v36, %v48_v34  ;;  %v133_v39 = vadd.f32 %v102_v37, %v46_v35 }
  0xa6   :  { %152 = vst.msk [vmem:[%s412_s2 + $0x10] sm:$0xff] %vm29_vm0, %v135_v38  ;;  %150 = vst.msk [vmem:[%s412_s2] sm:$0xff] %vm29_vm0, %v133_v39 }
  0xa7   :  { %v108_v42 = vpop.xlane.xlu1 %107  ;;  %v104_v43 = vpop.xlane.xlu0 %103 }
  0xa8   :  { %v136_v44 = vadd.f32 %v108_v42, %v49_v40  ;;  %v134_v45 = vadd.f32 %v104_v43, %v47_v41 }
  0xaa   :  { %153 = vst.msk [vmem:[%s412_s2 + $0x18] sm:$0xff] %vm29_vm0, %v136_v44  ;;  %151 = vst.msk [vmem:[%s412_s2 + $0x8] sm:$0xff] %vm29_vm0, %v134_v45 }
  0xab   :  { %v112_v48 = vpop.xlane.xlu1 %111  ;;  %v110_v49 = vpop.xlane.xlu0 %109 }
  0xac   :  { %v138_v50 = vadd.f32 %v112_v48, %v51_v46  ;;  %v137_v51 = vadd.f32 %v110_v49, %v50_v47 }
  0xae   :  { %155 = vst.msk [vmem:[%s412_s2 + $0x28] sm:$0xff] %vm29_vm0, %v138_v50  ;;  %154 = vst.msk [vmem:[%s412_s2 + $0x20] sm:$0xff] %vm29_vm0, %v137_v51 }
  0xaf   :  { %v116_v54 = vpop.xlane.xlu1 %115  ;;  %v114_v55 = vpop.xlane.xlu0 %113 }
  0xb0   :  { %v140_v56 = vadd.f32 %v116_v54, %v53_v52  ;;  %v139_v57 = vadd.f32 %v114_v55, %v52_v53 }
  0xb2   :  { %157 = vst.msk [vmem:[%s412_s2 + $0x38] sm:$0xff] %vm29_vm0, %v140_v56  ;;  %156 = vst.msk [vmem:[%s412_s2 + $0x30] sm:$0xff] %vm29_vm0, %v139_v57 }
  0xb3   :  { %v120_v60 = vpop.xlane.xlu1 %119  ;;  %v118_v61 = vpop.xlane.xlu0 %117 }
  0xb4   :  { %v142_v62 = vadd.f32 %v120_v60, %v55_v58  ;;  %v141_v63 = vadd.f32 %v118_v61, %v54_v59 }
  0xb6   :  { %159 = vst.msk [vmem:[%s412_s2 + $0x48] sm:$0xff] %vm29_vm0, %v142_v62  ;;  %158 = vst.msk [vmem:[%s412_s2 + $0x40] sm:$0xff] %vm29_vm0, %v141_v63 }
  0xb7   :  { %v124_v2 = vpop.xlane.xlu1 %123  ;;  %v122_v3 = vpop.xlane.xlu0 %121 }
  0xb8   :  { %v144_v4 = vadd.f32 %v124_v2, %v57_v0  ;;  %v143_v5 = vadd.f32 %v122_v3, %v56_v1 }
  0xba   :  { %161 = vst.msk [vmem:[%s412_s2 + $0x58] sm:$0xff] %vm29_vm0, %v144_v4  ;;  %160 = vst.msk [vmem:[%s412_s2 + $0x50] sm:$0xff] %vm29_vm0, %v143_v5 }
  0xbb   :  { %v128_v8 = vpop.xlane.xlu1 %127  ;;  %v126_v9 = vpop.xlane.xlu0 %125 }
  0xbc   :  { %v146_v10 = vadd.f32 %v128_v8, %v59_v6  ;;  %v145_v11 = vadd.f32 %v126_v9, %v58_v7 }
  0xbe   :  { %163 = vst.msk [vmem:[%s412_s2 + $0x68] sm:$0xff] %vm29_vm0, %v146_v10  ;;  %162 = vst.msk [vmem:[%s412_s2 + $0x60] sm:$0xff] %vm29_vm0, %v145_v11 }
  0xbf   :  { %v132_v14 = vpop.xlane.xlu1 %131  ;;  %v130_v15 = vpop.xlane.xlu0 %129 }
  0xc0   :  { %v148_v16 = vadd.f32 %v132_v14, %v61_v12  ;;  %v147_v17 = vadd.f32 %v130_v15, %v60_v13 }
  0xc2   :  { %165 = vst.msk [vmem:[%s412_s2 + $0x78] sm:$0xff] %vm29_vm0, %v148_v16  ;;  %164 = vst.msk [vmem:[%s412_s2 + $0x70] sm:$0xff] %vm29_vm0, %v147_v17 }
  0xc3   :  { %170 = vsyncpa [#allocation3], 1 }

</bundles_post_ra>
